<compile_context>
chip_gen: v5e
topology: v5e:2x2
jax: 0.10.0
libtpu: 0.0.40
codegen_flags: <defaults>
</compile_context>

<pallas_src>
import numpy as np
import jax
import jax.numpy as jnp
from jax.experimental import pallas as pl
from jax.experimental.pallas import tpu as pltpu


# ---------------------------------------------------------------------------
# Shared epilogue: masked mean -> shared Linear(H, P) -> cosine similarity.
# ---------------------------------------------------------------------------
def _epilogue(pooled_sums, inv_cnt, w, b, out_ref):
    # pooled_sums: (TB, 2, H) f32 masked sums; inv_cnt: (TB, 2) f32.
    avg1 = pooled_sums[:, 0, :] * inv_cnt[:, 0:1]                 # (TB, H)
    avg2 = pooled_sums[:, 1, :] * inv_cnt[:, 1:2]                 # (TB, H)
    # Shared projection as two small MXU matmuls (no in-kernel concatenate /
    # split, which would materialize extra VMEM copies).
    p1 = jnp.dot(avg1, w, preferred_element_type=jnp.float32) + b  # (TB, P)
    p2 = jnp.dot(avg2, w, preferred_element_type=jnp.float32) + b
    dotp = jnp.sum(p1 * p2, axis=-1, keepdims=True)               # (TB, 1)
    ss1 = jnp.sum(p1 * p1, axis=-1, keepdims=True)
    ss2 = jnp.sum(p2 * p2, axis=-1, keepdims=True)
    eps = jnp.float32(1e-8)
    # F.cosine_similarity: dot / max(||p1|| * ||p2||, eps)  (product clamp).
    inv_den = jax.lax.rsqrt(jnp.maximum(ss1 * ss2, eps * eps))
    out_ref[...] = dotp * inv_den


# ---------------------------------------------------------------------------
# Dense streaming kernel: grid = (B//tb, S//ts), S is the trailing reduction.
# ---------------------------------------------------------------------------
def _dense_kernel(hs_ref, masks_ref, invcnt_ref, w_ref, b_ref, out_ref, sum_acc):
    # hs:      (TB, TS, H)   native dtype
    # masks:   (TB, 2, TS)   same dtype, stacked [target_1_mask, target_2_mask]
    # inv_cnt: (TB, 2)       f32 precomputed 1 / mask.sum(S)
    # sum_acc: (TB, 2, H)    f32 VMEM accumulator, resident across the S axis
    s = pl.program_id(1)

    @pl.when(s == 0)
    def _init():
        sum_acc[...] = jnp.zeros_like(sum_acc)

    # Both masked sums as one MXU contraction per tile (one pass over hs).
    sum_acc[...] += jnp.einsum(
        "bks,bsh->bkh", masks_ref[...], hs_ref[...],
        preferred_element_type=jnp.float32)

    @pl.when(s == pl.num_programs(1) - 1)
    def _finalize():
        _epilogue(sum_acc[...], invcnt_ref[...], w_ref[...], b_ref[...], out_ref)


# ---------------------------------------------------------------------------
# Sparse gather kernel: grid = (B//tb,); only W masked rows per example are
# DMA-gathered from HBM using scalar-prefetched row offsets.
# ---------------------------------------------------------------------------
def _make_sparse_kernel(tb, W):
    def kernel(rows_ref, maskw_ref, invcnt_ref, w_ref, b_ref, hs_hbm,
               out_ref, hsbuf, sem):
        # rows_ref: (B,) int32 absolute row starts into the (B*S, H) hs array
        # maskw:    (TB, 2, W)  windowed mask values
        # hs_hbm:   (B*S, H)    last_hidden_state, left in HBM (pl.ANY)
        # hsbuf:    (TB, W, H)  VMEM gather buffer
        i = pl.program_id(0)
        copies = []
        for r in range(tb):                       # static unroll (tb small)
            row = rows_ref[i * tb + r]            # scalar read from SMEM
            cp = pltpu.make_async_copy(
                hs_hbm.at[pl.ds(row, W), :], hsbuf.at[r], sem.at[r])
            cp.start()
            copies.append(cp)
        for cp in copies:
            cp.wait()

        pooled = jnp.einsum(
            "bks,bsh->bkh", maskw_ref[...], hsbuf[...],
            preferred_element_type=jnp.float32)    # (TB, 2, H)
        _epilogue(pooled, invcnt_ref[...], w_ref[...], b_ref[...], out_ref)

    return kernel


# ---------------------------------------------------------------------------
# Tile / VMEM helpers.
# ---------------------------------------------------------------------------
def _vmem_capacity_bytes():
    try:
        info = pltpu.get_tpu_info()
        cap = getattr(info, "vmem_capacity_bytes", None)
        if cap:
            return int(cap)
    except Exception:
        pass
    return 64 << 20  # conservative: v7x per-TensorCore VMEM


def _pick_tb(B):
    cands = [t for t in (32, 16, 8) if B % t == 0]
    # Prefer an even number (>= 2) of batch blocks so the "parallel" batch axis
    # keeps both TensorCores busy on megacore parts (v7x).
    for t in cands:
        n = B // t
        if n >= 2 and n % 2 == 0:
            return t
    return cands[0] if cands else B


def _pick_ts(S, tb, H, itemsize, vmem_cap):
    opts = [t for t in (2048, 1024, 512, 256, 128) if S % t == 0]
    if not opts:
        return S
    budget = int(vmem_cap * 0.40)   # room for double-buffered hs + everything else
    for t in opts:                  # largest tile that fits the budget
        if 2 * tb * t * H * itemsize <= budget:
            return t
    return opts[-1]


def _concrete_np(x):
    try:
        return np.asarray(jax.device_get(x), dtype=np.float32)
    except Exception:               # traced under jit -> dense fallback
        return None


# ---------------------------------------------------------------------------
# Forward wrapper.
# ---------------------------------------------------------------------------
def siamese_forward(hidden_state, target_1_mask, target_2_mask, fc_w, fc_b,
                    *, mode="auto", tb=None, ts=None):
    """Pallas implementation of SiameseNNBatch.forward given BERT hidden states.

    mode: "auto" (sparse gather when masks are concrete & spans are short),
          "dense" (always stream the full hidden state), or "sparse".
    """
    B, S, H = hidden_state.shape
    P = fc_w.shape[1]

    # Ingest last_hidden_state in its native dtype: a bare astype(bf16) here
    # would force an extra full HBM read+write of the tensor we are bound on.
    if hidden_state.dtype in (jnp.bfloat16, jnp.float32):
        compute_dtype = hidden_state.dtype
    else:
        compute_dtype = jnp.float32
    hs = hidden_state.astype(compute_dtype)        # no-op in the common case
    itemsize = hs.dtype.itemsize

    # Masked-mean denominators precomputed once (exact f32); zero-count masks
    # give inf/NaN exactly like the torch divide-by-zero (no guard).
    m1f = target_1_mask.astype(jnp.float32)
    m2f = target_2_mask.astype(jnp.float32)
    inv_cnt = 1.0 / jnp.stack([m1f.sum(axis=1), m2f.sum(axis=1)], axis=1)  # (B,2)

    w = fc_w.astype(jnp.float32)
    b = jnp.reshape(fc_b, (1, P)).astype(jnp.float32)

    vmem_cap = _vmem_capacity_bytes()
    if tb is None:
        tb = _pick_tb(B)
    if B % tb != 0 or (tb % 8 != 0 and tb != B):
        tb = B

    # ---- decide sparse vs dense -------------------------------------------
    use_sparse = False
    m1_np = m2_np = None
    if mode in ("auto", "sparse"):
        m1_np = _concrete_np(target_1_mask)
        m2_np = _concrete_np(target_2_mask)
        if m1_np is not None and m2_np is not None:
            union = (m1_np != 0) | (m2_np != 0)                     # (B, S)
            has_any = union.any(axis=1)
            first = np.where(has_any, union.argmax(axis=1), 0)
            last = np.where(has_any, S - 1 - union[:, ::-1].argmax(axis=1), 0)
            start = (first // 8) * 8                                # 8-aligned starts
            W = int(np.max(last - start + 1)) if B > 0 else 1
            W = int(-(-W // 8) * 8)                                 # round up to 8
            if W < S:
                start = np.minimum(start, S - W)
            else:
                W, start = S, np.zeros_like(start)
            use_sparse = True if mode == "sparse" else (2 * W <= S)
    if mode == "sparse" and not use_sparse:
        raise ValueError("mode='sparse' requires concrete (non-traced) masks")

    if use_sparse:
        # ---- sparse gather path: read only W rows per example from HBM ----
        idx = start[:, None] + np.arange(W)[None, :]                # (B, W)
        maskw_np = np.stack([np.take_along_axis(m1_np, idx, axis=1),
                             np.take_along_axis(m2_np, idx, axis=1)], axis=1)
        maskw = jnp.asarray(maskw_np, dtype=compute_dtype)          # (B, 2, W)
        rows = jnp.asarray((np.arange(B) * S + start).astype(np.int32))  # (B,)
        hs2d = hs.reshape(B * S, H)

        out = pl.pallas_call(
            _make_sparse_kernel(tb, W),
            out_shape=jax.ShapeDtypeStruct((B, 1), jnp.float32),
            grid_spec=pltpu.PrefetchScalarGridSpec(
                num_scalar_prefetch=1,
                grid=(B // tb,),
                in_specs=[
                    pl.BlockSpec((tb, 2, W), lambda i, rows: (i, 0, 0)),
                    pl.BlockSpec((tb, 2), lambda i, rows: (i, 0)),
                    pl.BlockSpec((H, P), lambda i, rows: (0, 0)),
                    pl.BlockSpec((1, P), lambda i, rows: (0, 0)),
                    pl.BlockSpec(memory_space=pl.ANY),   # hs stays in HBM
                ],
                out_specs=pl.BlockSpec((tb, 1), lambda i, rows: (i, 0)),
                scratch_shapes=[
                    pltpu.VMEM((tb, W, H), compute_dtype),   # gather buffer
                    pltpu.SemaphoreType.DMA((tb,)),          # one sem per row-window
                ],
            ),
            compiler_params=pltpu.CompilerParams(
                dimension_semantics=("parallel",)),
        )(rows, maskw, inv_cnt, w, b, hs2d)
        return out[:, 0]

    # ---- dense streaming path ---------------------------------------------
    if ts is None:
        ts = _pick_ts(S, tb, H, itemsize, vmem_cap)
    if S % ts != 0 or (ts % 128 != 0 and ts != S):
        ts = S

    masks = jnp.stack([m1f, m2f], axis=1).astype(compute_dtype)     # (B, 2, S)

    # Explicit VMEM budget: 2x (hs tile + mask tile) double buffers + weights
    # + f32 accumulator + margin, capped below the physical per-core VMEM.
    hs_tile = tb * ts * H * itemsize
    mask_tile = tb * 2 * ts * itemsize
    wbytes = H * P * 4 + P * 4
    scratch_bytes = tb * 2 * H * 4
    limit = 2 * (hs_tile + mask_tile) + 2 * wbytes + scratch_bytes + (8 << 20)
    limit = max(limit, 32 << 20)
    limit = min(limit, max(vmem_cap - (8 << 20), 32 << 20))

    out = pl.pallas_call(
        _dense_kernel,
        out_shape=jax.ShapeDtypeStruct((B, 1), jnp.float32),
        grid_spec=pltpu.PrefetchScalarGridSpec(
            num_scalar_prefetch=0,
            grid=(B // tb, S // ts),
            in_specs=[
                pl.BlockSpec((tb, ts, H), lambda i, s: (i, s, 0)),   # hs tile
                pl.BlockSpec((tb, 2, ts), lambda i, s: (i, 0, s)),   # mask tile
                pl.BlockSpec((tb, 2), lambda i, s: (i, 0)),          # 1/counts
                pl.BlockSpec((H, P), lambda i, s: (0, 0)),           # fc weight
                pl.BlockSpec((1, P), lambda i, s: (0, 0)),           # fc bias
            ],
            # Output block index constant along S -> resident, written once in
            # the finalize branch.
            out_specs=pl.BlockSpec((tb, 1), lambda i, s: (i, 0)),
            scratch_shapes=[pltpu.VMEM((tb, 2, H), jnp.float32)],
        ),
        compiler_params=pltpu.CompilerParams(
            dimension_semantics=("parallel", "arbitrary"),
            vmem_limit_bytes=int(limit)),
    )(hs, masks, inv_cnt, w, b)
    return out[:, 0]


# ---------------------------------------------------------------------------
# Pure-JAX reference mirroring the PyTorch forward (f32 math).
# ---------------------------------------------------------------------------
def reference_forward(hidden_state, m1, m2, fc_w, fc_b):
    hs = hidden_state.astype(jnp.float32)
    m1 = m1.astype(jnp.float32)
    m2 = m2.astype(jnp.float32)
    sum1 = (m1[:, :, None] * hs).sum(axis=1)
    sum2 = (m2[:, :, None] * hs).sum(axis=1)
    avg1 = sum1 / m1.sum(axis=1, keepdims=True)
    avg2 = sum2 / m2.sum(axis=1, keepdims=True)
    p1 = avg1 @ fc_w + fc_b.reshape(1, -1)
    p2 = avg2 @ fc_w + fc_b.reshape(1, -1)
    n1 = jnp.linalg.norm(p1, axis=-1)
    n2 = jnp.linalg.norm(p2, axis=-1)
    return jnp.sum(p1 * p2, axis=-1) / jnp.maximum(n1 * n2, 1e-8)


if __name__ == "__main__":
    def make_inputs(B, S, H, P, key):
        k_hs, k_w, k_b = jax.random.split(key, 3)
        # Synthetic BERT last_hidden_state (pretrained encoder not loadable);
        # stored bf16 like typical BERT activations.
        hidden_state = jax.random.normal(
            k_hs, (B, S, H), jnp.float32).astype(jnp.bfloat16)
        # Binary target masks marking contiguous spans of target tokens.
        target_1_mask = jnp.zeros((B, S), jnp.float32).at[:, 1:4].set(1.0)
        target_2_mask = jnp.zeros((B, S), jnp.float32).at[:, 5:7].set(1.0)
        # Deterministic nn.Linear(H, P) init, stored as (H, P) (transposed).
        bound = 1.0 / (H ** 0.5)
        fc_w = jax.random.uniform(k_w, (H, P), jnp.float32, -bound, bound)
        fc_b = jax.random.uniform(k_b, (1, P), jnp.float32, -bound, bound)
        return hidden_state, target_1_mask, target_2_mask, fc_w, fc_b

    # Case 1: tiny shapes consistent with the module (dense full-extent path:
    # the union window covers the whole 8-token sequence).
    args_small = make_inputs(2, 8, 32, 64, jax.random.PRNGKey(0))
    cos_small = jax.block_until_ready(siamese_forward(*args_small))
    ref_small = reference_forward(*args_small)
    assert cos_small.shape == (2,), cos_small.shape
    assert jnp.allclose(cos_small, ref_small, atol=2e-3, rtol=2e-3), (
        cos_small, ref_small)

    # Case 2: realistic tiled shapes -> auto-selected sparse gather path
    # (union target window = 8 rows of S=512 -> ~64x less HBM read).
    args_tiled = make_inputs(16, 512, 128, 64, jax.random.PRNGKey(1))
    ref_tiled = reference_forward(*args_tiled)
    cos_sparse = jax.block_until_ready(siamese_forward(*args_tiled))
    assert cos_sparse.shape == (16,), cos_sparse.shape
    assert jnp.allclose(cos_sparse, ref_tiled, atol=2e-3, rtol=2e-3), (
        cos_sparse, ref_tiled)

    # Case 3: same shapes through the dense streaming path (what runs when the
    # masks are traced or the target spans cover most of the sequence).
    cos_dense = jax.block_until_ready(siamese_forward(*args_tiled, mode="dense"))
    assert jnp.allclose(cos_dense, ref_tiled, atol=2e-3, rtol=2e-3), (
        cos_dense, ref_tiled)

    print("KERNEL_OK")
</pallas_src>

<mosaic_0001>
module attributes {stable_mosaic.version = 11 : i64} {
  func.func @_dense_kernel(%arg0: i32, %arg1: i32, %arg2: memref<2x8x32xbf16, #tpu.memory_space<vmem>>, %arg3: memref<2x2x8xbf16, #tpu.memory_space<vmem>>, %arg4: memref<2x2xf32, #tpu.memory_space<vmem>>, %arg5: memref<32x64xf32, #tpu.memory_space<vmem>>, %arg6: memref<1x64xf32, #tpu.memory_space<vmem>>, %arg7: memref<2x1xf32, #tpu.memory_space<vmem>>, %arg8: memref<2x2x32xf32, #tpu.memory_space<vmem>>) attributes {dimension_semantics = [#tpu.dimension_semantics<parallel>, #tpu.dimension_semantics<arbitrary>], iteration_bounds = array<i64: 1, 1>, scalar_prefetch = 0 : i64, scratch_operands = 1 : i64, tpu.core_type = #tpu.core_type<tc>, window_params = [{transform_indices = @transform_0, window_bounds = array<i64: 2, 8, 32>}, {transform_indices = @transform_1, window_bounds = array<i64: 2, 2, 8>}, {transform_indices = @transform_2, window_bounds = array<i64: 2, 2>}, {pipeline_mode = #tpu.pipeline_mode<synchronous>, transform_indices = @transform_3, window_bounds = array<i64: 32, 64>}, {pipeline_mode = #tpu.pipeline_mode<synchronous>, transform_indices = @transform_4, window_bounds = array<i64: 1, 64>}, {transform_indices = @transform_5, window_bounds = array<i64: 2, 1>}]} {
    %c0_i32 = arith.constant 0 : i32
    %0 = arith.cmpi eq, %arg1, %c0_i32 : i32
    %1 = arith.extui %0 : i1 to i32
    %c0_i32_0 = arith.constant 0 : i32
    %2 = arith.cmpi ne, %1, %c0_i32_0 : i32
    scf.if %2 {
      %cst_14 = arith.constant 0.000000e+00 : f32
      %12 = vector.broadcast %cst_14 : f32 to vector<2x2x32xf32>
      %c0_15 = arith.constant 0 : index
      %c0_16 = arith.constant 0 : index
      %c0_17 = arith.constant 0 : index
      %13 = vector.load %arg8[%c0_15, %c0_16, %c0_17] : memref<2x2x32xf32, #tpu.memory_space<vmem>>, vector<2x2x32xf32>
      tpu.vector_store %arg8[%c0_15, %c0_16, %c0_17], %12 {strides = array<i32>} : memref<2x2x32xf32, #tpu.memory_space<vmem>>, vector<2x2x32xf32>,
    } else {
    }
    %c0 = arith.constant 0 : index
    %c0_1 = arith.constant 0 : index
    %c0_2 = arith.constant 0 : index
    %3 = vector.load %arg8[%c0, %c0_1, %c0_2] : memref<2x2x32xf32, #tpu.memory_space<vmem>>, vector<2x2x32xf32>
    %c0_3 = arith.constant 0 : index
    %c0_4 = arith.constant 0 : index
    %c0_5 = arith.constant 0 : index
    %4 = vector.load %arg3[%c0_3, %c0_4, %c0_5] : memref<2x2x8xbf16, #tpu.memory_space<vmem>>, vector<2x2x8xbf16>
    %c0_6 = arith.constant 0 : index
    %c0_7 = arith.constant 0 : index
    %c0_8 = arith.constant 0 : index
    %5 = vector.load %arg2[%c0_6, %c0_7, %c0_8] : memref<2x8x32xbf16, #tpu.memory_space<vmem>>, vector<2x8x32xbf16>
    "tpu.trace_start"() <{level = 10 : i32, message = "bks,bsh->bkh"}> : () -> ()
    %cst = arith.constant dense<0.000000e+00> : vector<2x2x32xf32>
    %6 = tpu.matmul %4, %5, %cst {dimension_numbers = #tpu.dot_dimension_numbers<[2], [1], [1], [2], [0, 0, 0, 1, 1, 2], [0], [0]>} : vector<2x2x8xbf16>, vector<2x8x32xbf16>, vector<2x2x32xf32> -> vector<2x2x32xf32>
    "tpu.trace_stop"() : () -> ()
    %7 = arith.addf %3, %6 : vector<2x2x32xf32>
    %c0_9 = arith.constant 0 : index
    %c0_10 = arith.constant 0 : index
    %c0_11 = arith.constant 0 : index
    %8 = vector.load %arg8[%c0_9, %c0_10, %c0_11] : memref<2x2x32xf32, #tpu.memory_space<vmem>>, vector<2x2x32xf32>
    tpu.vector_store %arg8[%c0_9, %c0_10, %c0_11], %7 {strides = array<i32>} : memref<2x2x32xf32, #tpu.memory_space<vmem>>, vector<2x2x32xf32>,
    %c0_i32_12 = arith.constant 0 : i32
    %9 = arith.cmpi eq, %arg1, %c0_i32_12 : i32
    %10 = arith.extui %9 : i1 to i32
    %c0_i32_13 = arith.constant 0 : i32
    %11 = arith.cmpi ne, %10, %c0_i32_13 : i32
    scf.if %11 {
      %c0_14 = arith.constant 0 : index
      %c0_15 = arith.constant 0 : index
      %c0_16 = arith.constant 0 : index
      %12 = vector.load %arg8[%c0_14, %c0_15, %c0_16] : memref<2x2x32xf32, #tpu.memory_space<vmem>>, vector<2x2x32xf32>
      %c0_17 = arith.constant 0 : index
      %c0_18 = arith.constant 0 : index
      %13 = vector.load %arg4[%c0_17, %c0_18] : memref<2x2xf32, #tpu.memory_space<vmem>>, vector<2x2xf32>
      %c0_19 = arith.constant 0 : index
      %c0_20 = arith.constant 0 : index
      %14 = vector.load %arg5[%c0_19, %c0_20] : memref<32x64xf32, #tpu.memory_space<vmem>>, vector<32x64xf32>
      %c0_21 = arith.constant 0 : index
      %c0_22 = arith.constant 0 : index
      %15 = vector.load %arg6[%c0_21, %c0_22] : memref<1x64xf32, #tpu.memory_space<vmem>>, vector<1x64xf32>
      %16 = vector.extract_strided_slice %12 {offsets = [0, 0, 0], sizes = [2, 1, 32], strides = [1, 1, 1]} : vector<2x2x32xf32> to vector<2x1x32xf32>
      %17 = vector.shape_cast %16 : vector<2x1x32xf32> to vector<2x32xf32>
      %18 = vector.extract_strided_slice %13 {offsets = [0, 0], sizes = [2, 1], strides = [1, 1]} : vector<2x2xf32> to vector<2x1xf32>
      %19 = vector.broadcast %18 : vector<2x1xf32> to vector<2x32xf32>
      %20 = arith.mulf %17, %19 : vector<2x32xf32>
      %21 = vector.extract_strided_slice %12 {offsets = [0, 1, 0], sizes = [2, 1, 32], strides = [1, 1, 1]} : vector<2x2x32xf32> to vector<2x1x32xf32>
      %22 = vector.shape_cast %21 : vector<2x1x32xf32> to vector<2x32xf32>
      %23 = vector.extract_strided_slice %13 {offsets = [0, 1], sizes = [2, 1], strides = [1, 1]} : vector<2x2xf32> to vector<2x1xf32>
      %24 = vector.broadcast %23 : vector<2x1xf32> to vector<2x32xf32>
      %25 = arith.mulf %22, %24 : vector<2x32xf32>
      %cst_23 = arith.constant dense<0.000000e+00> : vector<2x64xf32>
      %26 = tpu.matmul %20, %14, %cst_23 {dimension_numbers = #tpu.dot_dimension_numbers<[1], [0], [0], [1], [0, 0, 1, 1], [], []>} : vector<2x32xf32>, vector<32x64xf32>, vector<2x64xf32> -> vector<2x64xf32>
      %27 = vector.broadcast %15 : vector<1x64xf32> to vector<2x64xf32>
      %28 = arith.addf %26, %27 : vector<2x64xf32>
      %cst_24 = arith.constant dense<0.000000e+00> : vector<2x64xf32>
      %29 = tpu.matmul %25, %14, %cst_24 {dimension_numbers = #tpu.dot_dimension_numbers<[1], [0], [0], [1], [0, 0, 1, 1], [], []>} : vector<2x32xf32>, vector<32x64xf32>, vector<2x64xf32> -> vector<2x64xf32>
      %30 = vector.broadcast %15 : vector<1x64xf32> to vector<2x64xf32>
      %31 = arith.addf %29, %30 : vector<2x64xf32>
      %32 = arith.mulf %28, %31 : vector<2x64xf32>
      %cst_25 = arith.constant dense<0.000000e+00> : vector<2xf32>
      %33 = vector.multi_reduction <add>, %32, %cst_25 [1] : vector<2x64xf32> to vector<2xf32>
      %34 = vector.shape_cast %33 : vector<2xf32> to vector<2x1xf32>
      %35 = arith.mulf %28, %28 : vector<2x64xf32>
      %cst_26 = arith.constant dense<0.000000e+00> : vector<2xf32>
      %36 = vector.multi_reduction <add>, %35, %cst_26 [1] : vector<2x64xf32> to vector<2xf32>
      %37 = vector.shape_cast %36 : vector<2xf32> to vector<2x1xf32>
      %38 = arith.mulf %31, %31 : vector<2x64xf32>
      %cst_27 = arith.constant dense<0.000000e+00> : vector<2xf32>
      %39 = vector.multi_reduction <add>, %38, %cst_27 [1] : vector<2x64xf32> to vector<2xf32>
      %40 = vector.shape_cast %39 : vector<2xf32> to vector<2x1xf32>
      %41 = arith.mulf %37, %40 : vector<2x1xf32>
      %cst_28 = arith.constant 9.99999993E-9 : f32
      %cst_29 = arith.constant 9.99999993E-9 : f32
      %42 = arith.mulf %cst_28, %cst_29 : f32
      %43 = vector.broadcast %42 : f32 to vector<2x1xf32>
      %44 = arith.maximumf %41, %43 : vector<2x1xf32>
      %45 = math.rsqrt %44 : vector<2x1xf32>
      %46 = arith.mulf %34, %45 : vector<2x1xf32>
      %c0_30 = arith.constant 0 : index
      %c0_31 = arith.constant 0 : index
      %47 = vector.load %arg7[%c0_30, %c0_31] : memref<2x1xf32, #tpu.memory_space<vmem>>, vector<2x1xf32>
      tpu.vector_store %arg7[%c0_30, %c0_31], %46 {strides = array<i32>} : memref<2x1xf32, #tpu.memory_space<vmem>>, vector<2x1xf32>,
    } else {
    }
    return
  }
  func.func @transform_0(%arg0: i32, %arg1: i32) -> (i32, i32, i32) {
    %c0_i32 = arith.constant 0 : i32
    %c0_i32_0 = arith.constant 0 : i32
    return %arg0, %arg1, %c0_i32 : i32, i32, i32
  }
  func.func @transform_1(%arg0: i32, %arg1: i32) -> (i32, i32, i32) {
    %c0_i32 = arith.constant 0 : i32
    %c0_i32_0 = arith.constant 0 : i32
    return %arg0, %c0_i32, %arg1 : i32, i32, i32
  }
  func.func @transform_2(%arg0: i32, %arg1: i32) -> (i32, i32) {
    %c0_i32 = arith.constant 0 : i32
    %c0_i32_0 = arith.constant 0 : i32
    return %arg0, %c0_i32 : i32, i32
  }
  func.func @transform_3(%arg0: i32, %arg1: i32) -> (i32, i32) {
    %c0_i32 = arith.constant 0 : i32
    %c0_i32_0 = arith.constant 0 : i32
    %c0_i32_1 = arith.constant 0 : i32
    return %c0_i32, %c0_i32_0 : i32, i32
  }
  func.func @transform_4(%arg0: i32, %arg1: i32) -> (i32, i32) {
    %c0_i32 = arith.constant 0 : i32
    %c0_i32_0 = arith.constant 0 : i32
    %c0_i32_1 = arith.constant 0 : i32
    return %c0_i32, %c0_i32_0 : i32, i32
  }
  func.func @transform_5(%arg0: i32, %arg1: i32) -> (i32, i32) {
    %c0_i32 = arith.constant 0 : i32
    %c0_i32_0 = arith.constant 0 : i32
    return %arg0, %c0_i32 : i32, i32
  }
}

</mosaic_0001>

<bundles_post_ra>
// kernel: tpu_custom_call.1
= control target key start
LH: loop header
LB: loop body
LE: loop exit
PB: predicated region body
PF: predicated region fallthrough
CT: control target
= control target key end

     0   :  { %10 = vsyncpa [#allocation4], 0  ;;  %s449_s0 = inlined_call_operand.hbm [shape: bf16[2,8,32], index: 0, kind: input, shape index: {}]   ;;  %s450_s1 = inlined_call_operand.hbm [shape: bf16[2,2,8], index: 1, kind: input, shape index: {}]   ;;  %s451_s2 = inlined_call_operand.hbm [shape: f32[2,2], index: 2, kind: input, shape index: {}]   ;;  %s452_s3 = inlined_call_operand.hbm [shape: f32[32,64], index: 3, kind: input, shape index: {}]   ;;  %s453_s4 = inlined_call_operand.vmem [shape: f32[1,64], index: 4, kind: input, shape index: {}]   ;;  %s454_s5 = inlined_call_operand.vmem [shape: f32[2,1], index: 5, kind: output, shape index: {}]  }
   0x1   :  { %11 = vsyncpa [#allocation6], 0  ;;  %s30_s20 = sshll.u32 %s450_s1, 4  ;;  %s31_s20 = int_to_ptr.hbm [resolvable:$true] %s30_s20 }
   0x2   :  { %12 = vsyncpa [#allocation9], 0  ;;  %s384_s21 = smov [#allocation5]   ;;  %s17_s25 = sshll.u32 %s449_s0, 4  ;;  %s18_s25 = int_to_ptr.hbm [resolvable:$true] %s17_s25 }
   0x3   :  { %s32_s22 = sshll.u32 %s384_s21, 4  ;;  %s385_s26 = smov 16   ;;  %s33_s22 = int_to_ptr.vmem [resolvable:$true] %s32_s22 }
   0x4   :  { %s386_s27 = smov 1   ;;  %s387_s28 = smov [#allocation3]  }
   0x5   :  { %38 = dma.hbm_to_vmem [thread:$0]  %s31_s20, 32, %s33_s22, [#allocation6], %s385_s26, %s385_s26, %s386_s27  }
   0x6   :  { %s19_s29 = sshll.u32 %s387_s28, 4  ;;  %s388_s30 = smov 64   ;;  %s20_s29 = int_to_ptr.vmem [resolvable:$true] %s19_s29 }
   0x7   :  { %s389_s6 = smov 4   ;;  %s44_s8 = sshll.u32 %s451_s2, 4  ;;  %s45_s8 = int_to_ptr.hbm [resolvable:$true] %s44_s8 }
   0x8   :  { %25 = dma.hbm_to_vmem [thread:$0]  %s18_s25, 128, %s20_s29, [#allocation4], %s388_s30, %s388_s30, %s389_s6  }
   0x9   :  { %s390_s9 = smov [#allocation7]   ;;  %s54_s12 = sshll.u32 %s452_s3, 4  ;;  %s55_s12 = int_to_ptr.hbm [resolvable:$true] %s54_s12 }
   0xa   :  { %s46_s10 = sshll.u32 %s390_s9, 4  ;;  %s391_s13 = smov [#allocation8]   ;;  %s47_s10 = int_to_ptr.vmem [resolvable:$true] %s46_s10 }
   0xb   :  { %49 = dma.hbm_to_vmem [thread:$0]  %s45_s8, 32, %s47_s10, [#allocation6]  }
   0xc   :  { %s56_s14 = sshll.u32 %s391_s13, 4  ;;  %s392_s15 = smov 128   ;;  %s57_s14 = int_to_ptr.vmem [resolvable:$true] %s56_s14 }
   0xd   :  { %s393_s16 = smov 8  }
   0xe   :  { %62 = dma.hbm_to_vmem [thread:$0]  %s55_s12, 512, %s57_s14, [#allocation9], %s392_s15, %s392_s15, %s393_s16  }
   0xf   :  { %378 = dma.done.wait [#allocation4], 128  }
  0x10   :  { %379 = vsyncadd [#allocation4], 4294967168 }
  0x11   :  { %380 = dma.done.wait [#allocation6], 64  }
  0x12   :  { %381 = vsyncadd [#allocation6], 4294967232 }
  0x13   :  { %382 = dma.done.wait [#allocation9], 512  }
  0x14   :  { %383 = vsyncadd [#allocation9], 4294966784  ;;  %v394_v0 = vmov 0   ;;  %vm99_vm0 = vcmask 1043456   ;;  %v93_v1 = vld [vmem:[#allocation3] sm:$0xf] }
  0x15   :  { %277 = vset.pattern.permute.xlu0 %v394_v0  ;;  %v94_v2 = vld [vmem:[#allocation3 + $0x4] sm:$0xf]  ;;  %v101_v3 = vsel %vm99_vm0, %v93_v1, 0  ;;  %vm95_vm1 = vcmask 64512   ;;  %v145_v5 = vld [vmem:[#allocation7] sm:$0x3] }
  0x16   :  { %v120_v4 = vsel %vm99_vm0, %v94_v2, 0  ;;  %110 = vmatpush.bf16.msra.mxu0 %v101_v3  ;;  %v91_v6 = vld [vmem:[#allocation5] sm:$0x1]  ;;  %v92_v7 = vld [vmem:[#allocation5 + $0x1] sm:$0x1]  ;;  %153 = vperm.xlu0 %277, %v145_v5   ;;  %v395_v8 = vmov 1  }
  0x17   :  { %129 = vmatpush.bf16.msra.mxu1 %v120_v4  ;;  %vm86_vm2 = vcmask 254976   ;;  %v396_v9 = vmov 0.0   ;;  %v149_v10 = vld [vmem:[#allocation8 + $0x18] sm:$0xff]  ;;  %v148_v11 = vld [vmem:[#allocation8 + $0x10] sm:$0xff]  ;;  %v147_v12 = vld [vmem:[#allocation8 + $0x8] sm:$0xff]  ;;  %vm174_vm3 = vcmask 1041409  }
  0x18   :  { %87 = vst.msk [vmem:[#allocation2] sm:$0x3] %vm86_vm2, %v396_v9  ;;  %191 = vmatpush.msra.mxu2 %v149_v10  ;;  %217 = vmatpush.msra.mxu3 %v149_v10  ;;  %v146_v13 = vld [vmem:[#allocation8] sm:$0xff]  ;;  %vm176_vm4 = vcmask 261120   ;;  %v279_v36 = vld [vmem:[%s453_s4] ss:$0 sm:$0xff] }
  0x19   :  { %260 = vmatmul.msk.bf16.vlgmr.msra.gmra.mxu0 %vm95_vm1, %v91_v6  ;;  %88 = vst.msk [vmem:[#allocation2 + $0x2] sm:$0x3] %vm86_vm2, %v396_v9  ;;  %vm226_vm5 = vcmask 517120   ;;  %vm251_vm9 = vcmask 1024  }
  0x1a   :  { %261 = vmatmul.msk.bf16.vlgmr.msra.gmra.mxu1 %vm95_vm1, %v92_v7  ;;  %192 = vmatpush.msra.mxu2 %v148_v11 }
  0x1b   :  { %218 = vmatpush.msra.mxu3 %v148_v11 }
  0x1c   :  { %193 = vmatpush.msra.mxu2 %v147_v12 }
  0x1d   :  { %219 = vmatpush.msra.mxu3 %v147_v12 }
  0x1e   :  { %278 = vset.pattern.permute.xlu0 %v395_v8  ;;  %194 = vmatpush.msra.mxu2 %v146_v13 }
  0x1f   :  { %161 = vperm.xlu0 %278, %v145_v5   ;;  %220 = vmatpush.msra.mxu3 %v146_v13  ;;  %v89_v15 = vld [vmem:[#allocation2] sm:$0x3] }
  0x20   :  { %v90_v16 = vld [vmem:[#allocation2 + $0x2] sm:$0x3] }
  0x88   :  { %v154_v14 = vpop.permute.xlu0 %153 }
  0x89   :  { %v155_v23 = vrot.slane %v154_v14, 1 }
  0x91   :  { %v162_v21 = vpop.permute.xlu0 %161 }
  0x92   :  { %v163_v22 = vrot.slane %v162_v21, 7 }
  0x96   :  { %v112_v17 = vpop.f32.mrf.mxu0 }
  0x97   :  { %v131_v18 = vpop.f32.mrf.mxu1  ;;  %v135_v19 = vadd.f32 %v112_v17, %v89_v15 }
  0x98   :  { %v136_v20 = vadd.f32 %v131_v18, %v90_v16 }
  0x99   :  { %138 = vst.msk [vmem:[#allocation2] sm:$0x3] %vm86_vm2, %v135_v19 }
  0x9a   :  { %139 = vst.msk [vmem:[#allocation2 + $0x2] sm:$0x3] %vm86_vm2, %v136_v20 }
  0x9e   :  { %v114_v24 = vpop.f32.mrf.mxu0 }
  0x9f   :  { %v133_v25 = vpop.f32.mrf.mxu1 }
  0xa0   :  { %v143_v26 = vld [vmem:[#allocation2] sm:$0x3] }
  0xa1   :  { %v144_v27 = vld [vmem:[#allocation2 + $0x2] sm:$0x3]  ;;  %v166_v28 = vmul.f32 %v163_v22, %v143_v26  ;;  %v158_v32 = vmul.f32 %v154_v14, %v143_v26 }
  0xa2   :  { %v159_v29 = vmul.f32 %v155_v23, %v144_v27  ;;  %v167_v30 = vmul.f32 %v162_v21, %v144_v27 }
  0xa3   :  { %v201_v31 = vrot.slane %v166_v28, 1 }
  0xa4   :  { %v173_v33 = vrot.slane %v159_v29, 7 }
  0xa5   :  { %v202_v34 = vsel %vm174_vm3, %v167_v30, %v201_v31 }
  0xa6   :  { %v175_v35 = vsel %vm174_vm3, %v173_v33, %v158_v32  ;;  %263 = vmatmul.msk.f32.vlgmr.msra.gmra.mxu3 %vm176_vm4, %v202_v34 }
  0xa7   :  { %262 = vmatmul.msk.f32.vlgmr.msra.gmra.mxu2 %vm176_vm4, %v175_v35 }
 0x129   :  { %v222_v37 = vpop.f32.mrf.mxu3 }
 0x12a   :  { %v196_v38 = vpop.f32.mrf.mxu2  ;;  %v223_v39 = vadd.f32 %v279_v36, %v222_v37 }
 0x12b   :  { %v197_v40 = vadd.f32 %v279_v36, %v196_v38 }
 0x12c   :  { %v234_v45 = vmul.f32 %v223_v39, %v223_v39 }
 0x12d   :  { %v230_v41 = vmul.f32 %v197_v40, %v197_v40  ;;  %v225_v42 = vmul.f32 %v223_v39, %v197_v40 }
 0x12e   :  { %v235_v46 = vsel %vm226_vm5, %v234_v45, 0.0 }
 0x12f   :  { %v231_v43 = vsel %vm226_vm5, %v230_v41, 0.0  ;;  %v227_v44 = vsel %vm226_vm5, %v225_v42, 0.0 }
 0x130   :  { %232 = vadd.xlane.f32.xlu1 %v231_v43  ;;  %228 = vadd.xlane.f32.xlu2 %v227_v44 }
 0x138   :  { %236 = vadd.xlane.f32.xlu1 %v235_v46 }
 0x1a3   :  { %v233_v47 = vpop.xlane.xlu1 %232  ;;  %v229_v57 = vpop.xlane.xlu2 %228 }
 0x1ab   :  { %v237_v48 = vpop.xlane.xlu1 %236 }
 0x1ac   :  { %v238_v49 = vmul.f32 %v237_v48, %v233_v47 }
 0x1ae   :  { %v239_v50 = vmax.f32 %v238_v49, 1e-16 }
 0x1b0   :  { %280 = vrsqrt.f32 %v239_v50  ;;  %vm246_vm7 = vweird.f32 %v239_v50 }
 0x1b6   :  { %v281_v51 = vpop.eup %280 }
 0x1b7   :  { %v241_v52 = vmul.f32 %v281_v51, %v239_v50  ;;  %vm247_vm6 = vweird.f32 %v281_v51 }
 0x1b8   :  { %vm248_vm8 = vmor %vm246_vm7, %vm247_vm6 }
 0x1b9   :  { %v242_v53 = vmul.f32 %v281_v51, %v241_v52 }
 0x1bb   :  { %v243_v54 = vmul.f32 0.5, %v242_v53 }
 0x1bd   :  { %v244_v55 = vsub.f32 1.5, %v243_v54 }
 0x1bf   :  { %v245_v56 = vmul.f32 %v281_v51, %v244_v55 }
 0x1c1   :  { %v249_v58 = vsel %vm248_vm8, %v281_v51, %v245_v56 }
 0x1c2   :  { %v250_v59 = vmul.f32 %v249_v58, %v229_v57 }
 0x1c4   :  { %252 = vst.msk [vmem:[%s454_s5] sm:$0x3] %vm251_vm9, %v250_v59 }
 0x1c5   :  { %257 = vsyncpa [#allocation4], 1 }
 0x1c6   :  { %258 = vsyncpa [#allocation6], 1 }
 0x1c7   :  { %259 = vsyncpa [#allocation9], 1 }

</bundles_post_ra>
